<compile_context>
chip_gen: v7x
topology: tpu7x:2x2x1
jax: 0.10.0
libtpu: 0.0.40
codegen_flags: <defaults>
</compile_context>

<pallas_src>
import functools

import jax
import jax.numpy as jnp
from jax.experimental import pallas as pl
from jax.experimental.pallas import tpu as pltpu

# Lane/sublane-dense padded sizes for the module's fixed hidden dims.
H1P = 1024            # 1000 -> 1024 (l1 output width)
H2P = 128             # 100  -> 128  (l2 output width)
OP = 128              # 14   -> 128  (l3 output width, padded for the MXU)
OUT_DIM = 14          # true l3 / softmax width

# Row layout of the packed w2/w3(+b2,b3) buffer.
B2_ROW = H1P + H2P            # 1152 : l2 bias row
B3_ROW = H1P + H2P + 8        # 1160 : l3 bias row (8-row aligned read)
W23B_ROWS = H1P + H2P + 16    # 1168 : multiple of 16 -> dense bf16 sublane tiles


def _net_kernel(x_ref, w1b_ref, w23b_hbm, o_ref, w23b_vmem, sem):
    # Kick off the big w2/w3(+biases) copy immediately; it overlaps with the
    # layer-1 matmul below (w23b lives in HBM via memory_space=pl.ANY).
    cp = pltpu.make_async_copy(w23b_hbm, w23b_vmem, sem)
    cp.start()

    in_features = x_ref.shape[1]
    x = x_ref[...].astype(jnp.bfloat16)                                 # (B, F)
    w1 = w1b_ref[:in_features, :]                                        # (F, H1P) bf16
    b1 = w1b_ref[in_features:in_features + 1, :].astype(jnp.float32)    # (1, H1P)

    # l1: Linear(F, 1000) -- no activation (matches the module).
    h1 = jnp.dot(x, w1, preferred_element_type=jnp.float32) + b1        # (B, H1P) f32

    # Layers 2/3 need w2/w3: wait for the overlapped copy now.
    cp.wait()
    w2 = w23b_vmem[:H1P, :]                                              # (H1P, 128) bf16
    w3 = w23b_vmem[H1P:H1P + H2P, :]                                     # (H2P, 128) bf16
    b2 = w23b_vmem[B2_ROW:B2_ROW + 1, :].astype(jnp.float32)             # (1, 128)
    b3 = w23b_vmem[B3_ROW:B3_ROW + 1, :].astype(jnp.float32)             # (1, 128)

    # l2: Linear(1000, 100) + ReLU   (elementwise kept in fp32 -- v5e fast path)
    h2 = jnp.maximum(
        jnp.dot(h1.astype(jnp.bfloat16), w2, preferred_element_type=jnp.float32) + b2,
        0.0)

    # l3: Linear(100, 14)
    h3 = jnp.dot(h2.astype(jnp.bfloat16), w3, preferred_element_type=jnp.float32) + b3

    # Softmax over dim=0 (the batch axis), per column — exactly nn.Softmax(dim=0).
    # Only the real columns are kept; out block == full out array, so storing
    # the (B, 14) tile directly is legal and removes the post-kernel slice.
    h3 = h3[:, :o_ref.shape[1]]
    m = jnp.max(h3, axis=0, keepdims=True)
    e = jnp.exp(h3 - m)
    s = jnp.sum(e, axis=0, keepdims=True)
    o_ref[...] = (e * pl.reciprocal(s, approx=False)).astype(o_ref.dtype)


@functools.partial(jax.jit, static_argnames=("out_dim",))
def net_forward(x, w1b, w23b, out_dim=OUT_DIM):
    B, F = x.shape
    return pl.pallas_call(
        _net_kernel,
        out_shape=jax.ShapeDtypeStruct((B, out_dim), jnp.float32),
        grid=(),  # single program; whole problem fits easily in VMEM
        in_specs=[
            pl.BlockSpec((B, F), lambda: (0, 0)),
            pl.BlockSpec(w1b.shape, lambda: (0, 0)),
            pl.BlockSpec(memory_space=pl.ANY),   # w2/w3 stay in HBM, DMA'd manually
        ],
        out_specs=pl.BlockSpec((B, out_dim), lambda: (0, 0)),
        scratch_shapes=[
            pltpu.VMEM((W23B_ROWS, OP), jnp.bfloat16),
            pltpu.SemaphoreType.DMA(()),
        ],
        compiler_params=pltpu.CompilerParams(vmem_limit_bytes=4 << 20),
    )(x, w1b, w23b)


def prepare_params(w1, b1, w2, b2, w3, b3):
    """One-time packing: pad to lane-dense shapes, fold biases into the weight
    buffers as trailing rows, cast everything to bf16.  Two buffers -> two
    parameter DMAs per forward call."""
    f = w1.shape[0]
    w1_rows = ((f + 1 + 15) // 16) * 16   # weight rows + 1 bias row, 16-aligned
    w1b = jnp.zeros((w1_rows, H1P), jnp.float32)
    w1b = w1b.at[:f, :w1.shape[1]].set(w1)
    w1b = w1b.at[f, :b1.shape[-1]].set(b1.reshape(-1))

    w23b = jnp.zeros((W23B_ROWS, OP), jnp.float32)
    w23b = w23b.at[:w2.shape[0], :w2.shape[1]].set(w2)
    w23b = w23b.at[H1P:H1P + w3.shape[0], :w3.shape[1]].set(w3)
    w23b = w23b.at[B2_ROW, :b2.shape[-1]].set(b2.reshape(-1))
    w23b = w23b.at[B3_ROW, :b3.shape[-1]].set(b3.reshape(-1))
    return w1b.astype(jnp.bfloat16), w23b.astype(jnp.bfloat16)


def _init_linear(key, fan_in, fan_out):
    """PyTorch-style default init: U(-1/sqrt(fan_in), 1/sqrt(fan_in))."""
    kw, kb = jax.random.split(key)
    bound = 1.0 / jnp.sqrt(jnp.asarray(fan_in, jnp.float32))
    w = jax.random.uniform(kw, (fan_in, fan_out), jnp.float32, -bound, bound)
    b = jax.random.uniform(kb, (1, fan_out), jnp.float32, -bound, bound)
    return w, b


def _reference_packed(x, w1b, w23b, in_features):
    """Same bf16-quantized math as the kernel, in plain JAX (tight check)."""
    f32 = jnp.float32
    w1 = w1b[:in_features, :]
    b1 = w1b[in_features:in_features + 1, :].astype(f32)
    w2 = w23b[:H1P, :]
    w3 = w23b[H1P:H1P + H2P, :]
    b2 = w23b[B2_ROW:B2_ROW + 1, :].astype(f32)
    b3 = w23b[B3_ROW:B3_ROW + 1, :].astype(f32)
    h1 = jnp.dot(x.astype(jnp.bfloat16), w1, preferred_element_type=f32) + b1
    h2 = jax.nn.relu(
        jnp.dot(h1.astype(jnp.bfloat16), w2, preferred_element_type=f32) + b2)
    h3 = jnp.dot(h2.astype(jnp.bfloat16), w3, preferred_element_type=f32) + b3
    return jax.nn.softmax(h3, axis=0)[:, :OUT_DIM]


def _reference_f32(x, w1, b1, w2, b2, w3, b3):
    """Original full-fp32 module semantics (loose sanity check)."""
    h1 = x @ w1 + b1
    h2 = jax.nn.relu(h1 @ w2 + b2)
    h3 = h2 @ w3 + b3
    return jax.nn.softmax(h3, axis=0)


if __name__ == "__main__":
    # Net(input_size=8, output_size=4) -> l1 in_features = 8*4 = 32
    input_size, output_size = 8, 4
    in_features = input_size * output_size
    batch = 8

    key = jax.random.PRNGKey(0)
    kx, k1, k2, k3 = jax.random.split(key, 4)

    x = jax.random.normal(kx, (batch, in_features), jnp.float32)
    w1, b1 = _init_linear(k1, in_features, 1000)
    w2, b2 = _init_linear(k2, 1000, 100)
    w3, b3 = _init_linear(k3, 100, 14)

    # One-time packing/casting of the parameters (not part of per-step cost).
    w1b, w23b = jax.block_until_ready(prepare_params(w1, b1, w2, b2, w3, b3))

    out = net_forward(x, w1b, w23b, out_dim=OUT_DIM)
    out = jax.block_until_ready(out)

    assert out.shape == (batch, OUT_DIM)

    # Tight check vs an identically-quantized (bf16 weights) JAX reference.
    ref_bf16 = _reference_packed(x, w1b, w23b, in_features)
    assert jnp.allclose(out, ref_bf16, atol=1e-4, rtol=1e-4), \
        "mismatch vs bf16 reference"

    # Loose sanity check vs the original full-fp32 forward.
    ref_f32 = _reference_f32(x, w1, b1, w2, b2, w3, b3)
    assert jnp.allclose(out, ref_f32, atol=2e-2, rtol=2e-2), \
        "mismatch vs fp32 reference"

    # softmax(dim=0) => every column sums to 1 over the batch.
    assert jnp.allclose(out.sum(axis=0), jnp.ones((OUT_DIM,), jnp.float32),
                        atol=1e-4)

    print("KERNEL_OK")
</pallas_src>

<mosaic_0001>
module attributes {stable_mosaic.version = 11 : i64} {
  func.func @_net_kernel(%arg0: memref<8x32xf32, #tpu.memory_space<vmem>>, %arg1: memref<48x1024xbf16, #tpu.memory_space<vmem>>, %arg2: memref<1168x128xbf16, #tpu.memory_space<any>>, %arg3: memref<8x14xf32, #tpu.memory_space<vmem>>, %arg4: memref<1168x128xbf16, #tpu.memory_space<vmem>>, %arg5: memref<!tpu.dma_semaphore, #tpu.memory_space<semaphore_mem>>) attributes {dimension_semantics = [], scalar_prefetch = 0 : i64, scratch_operands = 2 : i64, tpu.core_type = #tpu.core_type<tc>} {
    tpu.enqueue_dma source(%arg2 : memref<1168x128xbf16, #tpu.memory_space<any>>) target(%arg4 : memref<1168x128xbf16, #tpu.memory_space<vmem>>) target_semaphore(%arg5 : memref<!tpu.dma_semaphore, #tpu.memory_space<semaphore_mem>>)
    %c0 = arith.constant 0 : index
    %c0_0 = arith.constant 0 : index
    %0 = vector.load %arg0[%c0, %c0_0] : memref<8x32xf32, #tpu.memory_space<vmem>>, vector<8x32xf32>
    %1 = arith.truncf %0 : vector<8x32xf32> to vector<8x32xbf16>
    %c0_1 = arith.constant 0 : index
    %c0_2 = arith.constant 0 : index
    %2 = vector.load %arg1[%c0_1, %c0_2] : memref<48x1024xbf16, #tpu.memory_space<vmem>>, vector<32x1024xbf16>
    %c32 = arith.constant 32 : index
    %c0_3 = arith.constant 0 : index
    %3 = vector.load %arg1[%c32, %c0_3] : memref<48x1024xbf16, #tpu.memory_space<vmem>>, vector<1x1024xbf16>
    %4 = arith.extf %3 : vector<1x1024xbf16> to vector<1x1024xf32>
    %cst = arith.constant dense<0.000000e+00> : vector<8x1024xf32>
    %5 = tpu.matmul %1, %2, %cst {dimension_numbers = #tpu.dot_dimension_numbers<[1], [0], [0], [1], [0, 0, 1, 1], [], []>} : vector<8x32xbf16>, vector<32x1024xbf16>, vector<8x1024xf32> -> vector<8x1024xf32>
    %6 = vector.broadcast %4 : vector<1x1024xf32> to vector<8x1024xf32>
    %7 = arith.addf %5, %6 : vector<8x1024xf32>
    tpu.wait_dma2 semaphore(%arg5 : memref<!tpu.dma_semaphore, #tpu.memory_space<semaphore_mem>>) src(%arg2 : memref<1168x128xbf16, #tpu.memory_space<any>>) dst(%arg4 : memref<1168x128xbf16, #tpu.memory_space<vmem>>)
    %c0_4 = arith.constant 0 : index
    %c0_5 = arith.constant 0 : index
    %8 = vector.load %arg4[%c0_4, %c0_5] : memref<1168x128xbf16, #tpu.memory_space<vmem>>, vector<1024x128xbf16>
    %c1024 = arith.constant 1024 : index
    %c0_6 = arith.constant 0 : index
    %9 = vector.load %arg4[%c1024, %c0_6] : memref<1168x128xbf16, #tpu.memory_space<vmem>>, vector<128x128xbf16>
    %c1152 = arith.constant 1152 : index
    %c0_7 = arith.constant 0 : index
    %10 = vector.load %arg4[%c1152, %c0_7] : memref<1168x128xbf16, #tpu.memory_space<vmem>>, vector<1x128xbf16>
    %11 = arith.extf %10 : vector<1x128xbf16> to vector<1x128xf32>
    %c1160 = arith.constant 1160 : index
    %c0_8 = arith.constant 0 : index
    %12 = vector.load %arg4[%c1160, %c0_8] : memref<1168x128xbf16, #tpu.memory_space<vmem>>, vector<1x128xbf16>
    %13 = arith.extf %12 : vector<1x128xbf16> to vector<1x128xf32>
    %14 = arith.truncf %7 : vector<8x1024xf32> to vector<8x1024xbf16>
    %cst_9 = arith.constant dense<0.000000e+00> : vector<8x128xf32>
    %15 = tpu.matmul %14, %8, %cst_9 {dimension_numbers = #tpu.dot_dimension_numbers<[1], [0], [0], [1], [0, 0, 1, 1], [], []>} : vector<8x1024xbf16>, vector<1024x128xbf16>, vector<8x128xf32> -> vector<8x128xf32>
    %16 = vector.broadcast %11 : vector<1x128xf32> to vector<8x128xf32>
    %17 = arith.addf %15, %16 : vector<8x128xf32>
    %cst_10 = arith.constant 0.000000e+00 : f32
    %18 = vector.broadcast %cst_10 : f32 to vector<8x128xf32>
    %19 = arith.maximumf %17, %18 : vector<8x128xf32>
    %20 = arith.truncf %19 : vector<8x128xf32> to vector<8x128xbf16>
    %cst_11 = arith.constant dense<0.000000e+00> : vector<8x128xf32>
    %21 = tpu.matmul %20, %9, %cst_11 {dimension_numbers = #tpu.dot_dimension_numbers<[1], [0], [0], [1], [0, 0, 1, 1], [], []>} : vector<8x128xbf16>, vector<128x128xbf16>, vector<8x128xf32> -> vector<8x128xf32>
    %22 = vector.broadcast %13 : vector<1x128xf32> to vector<8x128xf32>
    %23 = arith.addf %21, %22 : vector<8x128xf32>
    %24 = vector.extract_strided_slice %23 {offsets = [0, 0], sizes = [8, 14], strides = [1, 1]} : vector<8x128xf32> to vector<8x14xf32>
    %cst_12 = arith.constant dense<0xFF800000> : vector<14xf32>
    %25 = vector.multi_reduction <maximumf>, %24, %cst_12 [0] : vector<8x14xf32> to vector<14xf32>
    %26 = vector.shape_cast %25 : vector<14xf32> to vector<1x14xf32>
    %27 = vector.broadcast %26 : vector<1x14xf32> to vector<8x14xf32>
    %28 = arith.subf %24, %27 : vector<8x14xf32>
    %29 = math.exp %28 : vector<8x14xf32>
    %cst_13 = arith.constant dense<0.000000e+00> : vector<14xf32>
    %30 = vector.multi_reduction <add>, %29, %cst_13 [0] : vector<8x14xf32> to vector<14xf32>
    %31 = vector.shape_cast %30 : vector<14xf32> to vector<1x14xf32>
    %32 = tpu.reciprocal %31 : vector<1x14xf32> -> vector<1x14xf32>
    %33 = vector.broadcast %32 : vector<1x14xf32> to vector<8x14xf32>
    %34 = arith.mulf %29, %33 : vector<8x14xf32>
    %c0_14 = arith.constant 0 : index
    %c0_15 = arith.constant 0 : index
    %35 = vector.load %arg3[%c0_14, %c0_15] : memref<8x14xf32, #tpu.memory_space<vmem>>, vector<8x14xf32>
    tpu.vector_store %arg3[%c0_14, %c0_15], %34 {strides = array<i32>} : memref<8x14xf32, #tpu.memory_space<vmem>>, vector<8x14xf32>,
    return
  }
}

</mosaic_0001>

<bundles_post_ra>
// kernel: net_forward.1
= control target key start
LH: loop header
LB: loop body
LE: loop exit
PB: predicated region body
PF: predicated region fallthrough
CT: control target
= control target key end

     0   :  { %8 = vsyncpa [#allocation5], 0  ;;  %s1079_s0 = inlined_call_operand.hbm [shape: f32[8,32], index: 0, kind: input, shape index: {}]   ;;  %s1080_s1 = inlined_call_operand.hbm [shape: bf16[48,1024], index: 1, kind: input, shape index: {}]   ;;  %s1081_s2 = inlined_call_operand.hbm [shape: bf16[1168,128], index: 2, kind: input, shape index: {}]   ;;  %s1082_s3 = inlined_call_operand.hbm [shape: f32[8,14], index: 3, kind: output, shape index: {}]  }
   0x1   :  { %9 = vsyncpa [#allocation8], 0 }
   0x2   :  { %10 = vsyncpa [#allocation6], 0  ;;  %s952_s12 = smov [#allocation4]   ;;  %s953_s14 = smov [#allocation7]  }
   0x3   :  { %s17_s13 = sshll.u32 %s952_s12, 4  ;;  %s26_s15 = sshll.u32 %s953_s14, 4  ;;  %s18_s13 = int_to_ptr.vmem [resolvable:$true] %s17_s13  ;;  %s981_s15 = int_to_ptr.vmem [resolvable:$true] %s26_s15 }
   0x4   :  { %s856_s18 = scalar_lea.hbm %s1079_s0, 128 }
   0x5   :  { %p857_p0 = scmp.ne.s32.totalorder %s1079_s0, %s856_s18  ;;  %p860_p1 = scmp.lt.u32.totalorder %s856_s18, %s1079_s0 }
   0x7   :  { %p862_p2 = pnand %p860_p1, %p857_p0 }
   0x9   :  { %865 = shalt.err (!%p862_p2)
}
   0xa   :  { %s866_s23 = scalar_lea.vmem %s18_s13, 128  ;;  %p871_p4 = scmp.lt.s32.totalorder %s18_s13, %s18_s13 }
   0xb   :  { %p867_p3 = scmp.ne.s32.totalorder %s18_s13, %s866_s23  ;;  %p872_p5 = scmp.lt.s32.totalorder %s866_s23, %s866_s23 }
   0xd   :  { %p873_p6 = por %p872_p5, %p871_p4 }
   0xf   :  { %p874_p7 = pnand %p873_p6, %p867_p3 }
  0x11   :  { %877 = shalt.err (!%p874_p7)
}
  0x12   :  { %20 = dma.hbm_to_vmem [thread:$0]  %s1079_s0, 128, %s18_s13, [#allocation5]  }
  0x13   :  { %s878_s28 = scalar_lea.hbm %s1080_s1, 3072 }
  0x14   :  { %p879_p8 = scmp.ne.s32.totalorder %s1080_s1, %s878_s28  ;;  %p882_p9 = scmp.lt.u32.totalorder %s878_s28, %s1080_s1 }
  0x16   :  { %p884_p10 = pnand %p882_p9, %p879_p8 }
  0x18   :  { %887 = shalt.err (!%p884_p10)
}
  0x19   :  { %s888_s6 = scalar_lea.vmem %s981_s15, 3072  ;;  %p893_p12 = scmp.lt.s32.totalorder %s981_s15, %s981_s15 }
  0x1a   :  { %p889_p11 = scmp.ne.s32.totalorder %s981_s15, %s888_s6  ;;  %p894_p13 = scmp.lt.s32.totalorder %s888_s6, %s888_s6 }
  0x1c   :  { %p895_p0 = por %p894_p13, %p893_p12 }
  0x1e   :  { %p896_p1 = pnand %p895_p0, %p889_p11 }
  0x20   :  { %899 = shalt.err (!%p896_p1)
}
  0x21   :  { %s954_s0 = smov 512   ;;  %s955_s7 = smov 32  }
  0x22   :  { %32 = dma.hbm_to_vmem [thread:$0]  %s1080_s1, 3072, %s981_s15, [#allocation8], %s954_s0, %s954_s0, %s955_s7  }
  0x23   :  { %944 = dma.done.wait [#allocation5], 128  }
  0x24   :  { %945 = vsyncadd [#allocation5], 4294967168 }
  0x25   :  { %946 = dma.done.wait [#allocation8], 3072  }
  0x26   :  { %947 = vsyncadd [#allocation8], 4294964224  ;;  %v956_v0 = vmov 0   ;;  %v53_v1 = vld [vmem:[#allocation7] sm:$0xff]  ;;  %v54_v8 = vld [vmem:[#allocation7 + $0x8] sm:$0xff]  ;;  %vm193_vm0 = vcmask 261120  }
  0x27   :  { %229 = vmatprep.mubr.bf16.mxu1 %v956_v0  ;;  %v57_v2 = vld [vmem:[#allocation7 + $0x20] sm:$0xff]  ;;  %v58_v9 = vld [vmem:[#allocation7 + $0x28] sm:$0xff]  ;;  %v51_v11 = vld [vmem:[#allocation4] sm:$0xff]  ;;  %s957_s1 = smov [#allocation2]   ;;  %s900_s13 = scalar_lea.hbm %s1081_s2, 9344 }
  0x28   :  { %v61_v3 = vld [vmem:[#allocation7 + $0x40] sm:$0xff]  ;;  %v706_v4 = vcombine.high %v53_v1, %v57_v2  ;;  %v705_v5 = vcombine.low %v53_v1, %v57_v2  ;;  %v708_v12 = vcombine.high %v54_v8, %v58_v9  ;;  %v62_v13 = vld [vmem:[#allocation7 + $0x48] sm:$0xff]  ;;  %v52_v15 = vpack.c.bf16 %v51_v11, %v51_v11  ;;  %v55_v18 = vld [vmem:[#allocation7 + $0x10] sm:$0xff]  ;;  %s47_s10 = sshll.u32 %s957_s1, 4  ;;  %p901_p2 = scmp.ne.s32.totalorder %s1081_s2, %s900_s13  ;;  %s48_s10 = int_to_ptr.vmem [resolvable:$true] %s47_s10 }
  0x29   :  { %v65_v6 = vld [vmem:[#allocation7 + $0x60] sm:$0xff]  ;;  %v66_v14 = vld [vmem:[#allocation7 + $0x68] sm:$0xff]  ;;  %v707_v16 = vcombine.low %v54_v8, %v58_v9  ;;  %v59_v19 = vld [vmem:[#allocation7 + $0x30] sm:$0xff]  ;;  %p904_p3 = scmp.lt.u32.totalorder %s900_s13, %s1081_s2 }
  0x2a   :  { %v714_v7 = vcombine.high %v61_v3, %v65_v6  ;;  %197 = vmatprep.subr.bf16.mxu1 %v706_v4  ;;  %v713_v10 = vcombine.low %v61_v3, %v65_v6  ;;  %v716_v17 = vcombine.high %v62_v13, %v66_v14  ;;  %v715_v20 = vcombine.low %v62_v13, %v66_v14  ;;  %v63_v22 = vld [vmem:[#allocation7 + $0x50] sm:$0xff]  ;;  %v56_v26 = vld [vmem:[#allocation7 + $0x18] sm:$0xff] }
  0x2b   :  { %198 = vmatpush1.bf16.msra.mxu1 %v705_v5  ;;  %v710_v21 = vcombine.high %v55_v18, %v59_v19  ;;  %v67_v23 = vld [vmem:[#allocation7 + $0x70] sm:$0xff]  ;;  %v709_v24 = vcombine.low %v55_v18, %v59_v19  ;;  %v60_v27 = vld [vmem:[#allocation7 + $0x38] sm:$0xff]  ;;  %p906_p4 = pnand %p904_p3, %p901_p2 }
  0x2c   :  { %199 = vmatprep.subr.bf16.mxu1 %v714_v7  ;;  %v718_v25 = vcombine.high %v63_v22, %v67_v23  ;;  %v717_v28 = vcombine.low %v63_v22, %v67_v23  ;;  %v712_v29 = vcombine.high %v56_v26, %v60_v27  ;;  %v64_v30 = vld [vmem:[#allocation7 + $0x58] sm:$0xff]  ;;  %v711_v32 = vcombine.low %v56_v26, %v60_v27 }
  0x2d   :  { %v68_v31 = vld [vmem:[#allocation7 + $0x78] sm:$0xff] }
  0x2e   :  { %v720_v33 = vcombine.high %v64_v30, %v68_v31  ;;  %v719_v34 = vcombine.low %v64_v30, %v68_v31 }
  0x2f   :  { %200 = vmatpush1.bf16.msra.mxu1 %v713_v10 }
  0x30   :  { %238 = vmatprep.subr.bf16.mxu1 %v708_v12 }
  0x32   :  { %721 = vmatmul.mubr.msk.bf16.vlgmr.msra.gmra.mrb[0].mxu1 %vm193_vm0, %v52_v15 }
  0x33   :  { %239 = vmatpush1.bf16.msra.mxu1 %v707_v16  ;;  %270 = vmatprep.mubr.bf16.mxu1 %v956_v0 }
  0x34   :  { %240 = vmatprep.subr.bf16.mxu1 %v716_v17 }
  0x37   :  { %241 = vmatpush1.bf16.msra.mxu1 %v715_v20 }
  0x38   :  { %279 = vmatprep.subr.bf16.mxu1 %v710_v21 }
  0x3a   :  { %722 = vmatmul.mubr.msk.bf16.vlgmr.msra.gmra.mrb[4].mxu1 %vm193_vm0, %v52_v15 }
  0x3b   :  { %280 = vmatpush1.bf16.msra.mxu1 %v709_v24  ;;  %311 = vmatprep.mubr.bf16.mxu1 %v956_v0 }
  0x3c   :  { %281 = vmatprep.subr.bf16.mxu1 %v718_v25 }
  0x3f   :  { %282 = vmatpush1.bf16.msra.mxu1 %v717_v28 }
  0x40   :  { %320 = vmatprep.subr.bf16.mxu1 %v712_v29 }
  0x42   :  { %723 = vmatmul.mubr.msk.bf16.vlgmr.msra.gmra.mrb[8].mxu1 %vm193_vm0, %v52_v15 }
  0x43   :  { %321 = vmatpush1.bf16.msra.mxu1 %v711_v32  ;;  %352 = vmatprep.mubr.bf16.mxu1 %v956_v0 }
  0x44   :  { %322 = vmatprep.subr.bf16.mxu1 %v720_v33 }
  0x47   :  { %323 = vmatpush1.bf16.msra.mxu1 %v719_v34 }
  0x4a   :  { %724 = vmatmul.mubr.msk.bf16.vlgmr.msra.gmra.mrb[12].mxu1 %vm193_vm0, %v52_v15 }
  0x4b   :  { %909 = shalt.err (!%p906_p4)  }
  0x4c   :  { %s910_s18 = scalar_lea.vmem %s48_s10, 9344  ;;  %p915_p6 = scmp.lt.s32.totalorder %s48_s10, %s48_s10 }
  0x4d   :  { %p911_p5 = scmp.ne.s32.totalorder %s48_s10, %s910_s18  ;;  %p916_p7 = scmp.lt.s32.totalorder %s910_s18, %s910_s18 }
  0x4f   :  { %p917_p8 = por %p916_p7, %p915_p6 }
  0x51   :  { %p918_p9 = pnand %p917_p8, %p911_p5 }
  0x53   :  { %921 = shalt.err (!%p918_p9)  }
  0x54   :  { %50 = dma.hbm_to_vmem [thread:$0]  %s1081_s2, 9344, %s48_s10, [#allocation3]  ;;  %v81_v35 = vlaneseq  ;;  %v69_v37 = vld [vmem:[#allocation7 + $0x80] sm:$0x11]  ;;  %v70_v43 = vld [vmem:[#allocation7 + $0x88] sm:$0x11] }
  0x55   :  { %v73_v38 = vunpack.c.l.bf16 %v69_v37  ;;  %v74_v40 = vunpack.c.h.bf16 %v69_v37  ;;  %v75_v47 = vunpack.c.l.bf16 %v70_v43  ;;  %v76_v50 = vunpack.c.h.bf16 %v70_v43  ;;  %v71_v54 = vld [vmem:[#allocation7 + $0x90] sm:$0x11]  ;;  %v72_v1 = vld [vmem:[#allocation7 + $0x98] sm:$0x11] }
  0x56   :  { %v82_v36 = vshrl.u32 %v81_v35, 7  ;;  %v77_v58 = vunpack.c.l.bf16 %v71_v54  ;;  %v78_v61 = vunpack.c.h.bf16 %v71_v54  ;;  %v79_v5 = vunpack.c.l.bf16 %v72_v1 }
  0x57   :  { %v80_v8 = vunpack.c.h.bf16 %v72_v1 }
  0x58   :  { %v1028_v39 = vsub.s32 0, %v82_v36 }
  0x5a   :  { %v84_v41 = vrot.slane %v73_v38, %v1028_v39  ;;  %v88_v42 = vrot.slane %v74_v40, %v1028_v39  ;;  %v92_v52 = vrot.slane %v75_v47, %v1028_v39  ;;  %v96_v53 = vrot.slane %v76_v50, %v1028_v39 }
  0x5b   :  { %v100_v63 = vrot.slane %v77_v58, %v1028_v39  ;;  %v104_v0 = vrot.slane %v78_v61, %v1028_v39  ;;  %v108_v10 = vrot.slane %v79_v5, %v1028_v39  ;;  %v112_v11 = vrot.slane %v80_v8, %v1028_v39 }
 0x105   :  { %v231_v44 = vpop.f32.mrb[0].mxu1 }
 0x106   :  { %v1032_v45 = vadd.f32 %v231_v44, %v84_v41  ;;  %v233_v46 = vpop.f32.mrb[1].mxu1 }
 0x107   :  { %v234_v48 = vadd.f32 %v233_v46, %v88_v42  ;;  %v235_v49 = vpop.f32.mrb[2].mxu1 }
 0x108   :  { %v236_v51 = vpop.f32.mrb[3].mxu1 }
 0x10d   :  { %v272_v55 = vpop.f32.mrb[4].mxu1 }
 0x10e   :  { %v1036_v56 = vadd.f32 %v272_v55, %v92_v52  ;;  %v274_v57 = vpop.f32.mrb[5].mxu1 }
 0x10f   :  { %v275_v59 = vadd.f32 %v274_v57, %v96_v53  ;;  %v276_v60 = vpop.f32.mrb[6].mxu1 }
 0x110   :  { %v277_v62 = vpop.f32.mrb[7].mxu1 }
 0x115   :  { %v313_v2 = vpop.f32.mrb[8].mxu1 }
 0x116   :  { %v1040_v3 = vadd.f32 %v313_v2, %v100_v63  ;;  %v315_v4 = vpop.f32.mrb[9].mxu1 }
 0x117   :  { %v1042_v6 = vadd.f32 %v315_v4, %v104_v0  ;;  %v317_v7 = vpop.f32.mrb[10].mxu1 }
 0x118   :  { %v318_v9 = vpop.f32.mrb[11].mxu1 }
 0x11d   :  { %v354_v12 = vpop.f32.mrb[12].mxu1 }
 0x11e   :  { %v1046_v13 = vadd.f32 %v354_v12, %v108_v10  ;;  %v356_v14 = vpop.f32.mrb[13].mxu1 }
 0x11f   :  { %v1048_v15 = vadd.f32 %v356_v14, %v112_v11  ;;  %v358_v16 = vpop.f32.mrb[14].mxu1 }
 0x120   :  { %v359_v17 = vpop.f32.mrb[15].mxu1 }
 0x121   :  { %948 = dma.done.wait [#allocation3], 9344 }
 0x122   :  { %949 = vsyncadd [#allocation3], 4294957952  ;;  %v445_v18 = vpack.c.bf16 %v234_v48, %v234_v48  ;;  %v447_v19 = vpack.c.bf16 %v275_v59, %v275_v59  ;;  %v373_v20 = vld [vmem:[#allocation2 + $0x40] sm:$0xff]  ;;  %v374_v24 = vld [vmem:[#allocation2 + $0x48] sm:$0xff]  ;;  %v444_v57 = vpack.c.bf16 %v1032_v45, %v1032_v45  ;;  %v446_v58 = vpack.c.bf16 %v1036_v56, %v1036_v56  ;;  %s960_s2 = smov [#allocation9]  }
 0x123   :  { %v389_v21 = vld [vmem:[#allocation2 + $0xc0] sm:$0xff]  ;;  %726 = vmatprep.subr.bf16.mxu0 %v373_v20  ;;  %v390_v25 = vld [vmem:[#allocation2 + $0xc8] sm:$0xff]  ;;  %v375_v28 = vld [vmem:[#allocation2 + $0x50] sm:$0xff]  ;;  %v449_v63 = vpack.c.bf16 %v1042_v6, %v1042_v6  ;;  %v451_v0 = vpack.c.bf16 %v1048_v15, %v1048_v15  ;;  %vm959_vm1 = vmmov 0   ;;  %vm662_vm2 = vcmask 113664   ;;  %s689_s21 = sshll.u32 %s960_s2, 4  ;;  %s690_s21 = int_to_ptr.vmem [resolvable:$true] %s689_s21 }
 0x124   :  { %488 = vmatprep.mubr.bf16.mxu0 %v445_v18  ;;  %528 = vmatprep.mubr.bf16.mxu1 %v447_v19  ;;  %v365_v22 = vld [vmem:[#allocation2] sm:$0xff]  ;;  %v366_v26 = vld [vmem:[#allocation2 + $0x8] sm:$0xff]  ;;  %v391_v29 = vld [vmem:[#allocation2 + $0xd0] sm:$0xff]  ;;  %s922_s22 = scalar_lea.vmem %s690_s21, 128  ;;  %p927_p11 = scmp.lt.s32.totalorder %s690_s21, %s690_s21 }
 0x125   :  { %748 = vmatprep.subr.bf16.mxu1 %v389_v21  ;;  %v381_v23 = vld [vmem:[#allocation2 + $0x80] sm:$0xff]  ;;  %727 = vmatpush3.bf16.msra.mxu0 %v365_v22  ;;  %v382_v27 = vld [vmem:[#allocation2 + $0x88] sm:$0xff]  ;;  %v367_v30 = vld [vmem:[#allocation2 + $0x10] sm:$0xff]  ;;  %p923_p10 = scmp.ne.s32.totalorder %s690_s21, %s922_s22  ;;  %p928_p12 = scmp.lt.s32.totalorder %s922_s22, %s922_s22 }
 0x126   :  { %749 = vmatpush3.bf16.msra.mxu1 %v381_v23  ;;  %728 = vmatprep.subr.bf16.mxu0 %v374_v24  ;;  %v383_v31 = vld [vmem:[#allocation2 + $0x90] sm:$0xff]  ;;  %v376_v32 = vld [vmem:[#allocation2 + $0x58] sm:$0xff]  ;;  %v377_v36 = vld [vmem:[#allocation2 + $0x60] sm:$0xff] }
 0x127   :  { %750 = vmatprep.subr.bf16.mxu1 %v390_v25  ;;  %v392_v33 = vld [vmem:[#allocation2 + $0xd8] sm:$0xff]  ;;  %v393_v37 = vld [vmem:[#allocation2 + $0xe0] sm:$0xff]  ;;  %v378_v41 = vld [vmem:[#allocation2 + $0x68] sm:$0xff]  ;;  %p929_p13 = por %p928_p12, %p927_p11 }
 0x128   :  { %v368_v34 = vld [vmem:[#allocation2 + $0x18] sm:$0xff]  ;;  %v369_v38 = vld [vmem:[#allocation2 + $0x20] sm:$0xff]  ;;  %v394_v42 = vld [vmem:[#allocation2 + $0xe8] sm:$0xff] }
 0x129   :  { %729 = vmatpush3.bf16.msra.mxu0 %v366_v26  ;;  %v384_v35 = vld [vmem:[#allocation2 + $0x98] sm:$0xff]  ;;  %v385_v40 = vld [vmem:[#allocation2 + $0xa0] sm:$0xff]  ;;  %v370_v43 = vld [vmem:[#allocation2 + $0x28] sm:$0xff]  ;;  %p930_p0 = pnand %p929_p13, %p923_p10 }
 0x12a   :  { %751 = vmatpush3.bf16.msra.mxu1 %v382_v27  ;;  %730 = vmatprep.subr.bf16.mxu0 %v375_v28  ;;  %v386_v44 = vld [vmem:[#allocation2 + $0xa8] sm:$0xff]  ;;  %v379_v46 = vld [vmem:[#allocation2 + $0x70] sm:$0xff]  ;;  %v380_v50 = vld [vmem:[#allocation2 + $0x78] sm:$0xff]  ;;  %v448_v27 = vpack.c.bf16 %v1040_v3, %v1040_v3  ;;  %v450_v28 = vpack.c.bf16 %v1046_v13, %v1046_v13 }
 0x12b   :  { %752 = vmatprep.subr.bf16.mxu1 %v391_v29  ;;  %v395_v47 = vld [vmem:[#allocation2 + $0xf0] sm:$0xff]  ;;  %v396_v51 = vld [vmem:[#allocation2 + $0xf8] sm:$0xff]  ;;  %v405_v54 = vld [vmem:[#allocation2 + $0x140] sm:$0xff] }
 0x12c   :  { %v371_v48 = vld [vmem:[#allocation2 + $0x30] sm:$0xff]  ;;  %v372_v52 = vld [vmem:[#allocation2 + $0x38] sm:$0xff]  ;;  %v421_v55 = vld [vmem:[#allocation2 + $0x1c0] sm:$0xff] }
 0x12d   :  { %731 = vmatpush3.bf16.msra.mxu0 %v367_v30  ;;  %v387_v49 = vld [vmem:[#allocation2 + $0xb0] sm:$0xff]  ;;  %v388_v53 = vld [vmem:[#allocation2 + $0xb8] sm:$0xff]  ;;  %v397_v59 = vld [vmem:[#allocation2 + $0x100] sm:$0xff]  ;;  %v958_v30 = vmov 0.0  }
 0x12e   :  { %753 = vmatpush3.bf16.msra.mxu1 %v383_v31  ;;  %732 = vmatprep.subr.bf16.mxu0 %v376_v32  ;;  %v413_v60 = vld [vmem:[#allocation2 + $0x180] sm:$0xff]  ;;  %v406_v61 = vld [vmem:[#allocation2 + $0x148] sm:$0xff]  ;;  %v407_v1 = vld [vmem:[#allocation2 + $0x150] sm:$0xff] }
 0x12f   :  { %754 = vmatprep.subr.bf16.mxu1 %v392_v33  ;;  %v422_v62 = vld [vmem:[#allocation2 + $0x1c8] sm:$0xff]  ;;  %v423_v2 = vld [vmem:[#allocation2 + $0x1d0] sm:$0xff]  ;;  %v408_v6 = vld [vmem:[#allocation2 + $0x158] sm:$0xff] }
 0x130   :  { %v398_v45 = vld [vmem:[#allocation2 + $0x108] sm:$0xff]  ;;  %v399_v4 = vld [vmem:[#allocation2 + $0x110] sm:$0xff]  ;;  %v424_v7 = vld [vmem:[#allocation2 + $0x1d8] sm:$0xff] }
 0x131   :  { %733 = vmatpush3.bf16.msra.mxu0 %v368_v34  ;;  %v414_v56 = vld [vmem:[#allocation2 + $0x188] sm:$0xff]  ;;  %v415_v5 = vld [vmem:[#allocation2 + $0x190] sm:$0xff]  ;;  %v400_v8 = vld [vmem:[#allocation2 + $0x118] sm:$0xff] }
 0x132   :  { %755 = vmatpush3.bf16.msra.mxu1 %v384_v35  ;;  %734 = vmatprep.subr.bf16.mxu0 %v377_v36  ;;  %v416_v9 = vld [vmem:[#allocation2 + $0x198] sm:$0xff]  ;;  %v409_v10 = vld [vmem:[#allocation2 + $0x160] sm:$0xff]  ;;  %v410_v15 = vld [vmem:[#allocation2 + $0x168] sm:$0xff] }
 0x133   :  { %756 = vmatprep.subr.bf16.mxu1 %v393_v37  ;;  %v425_v11 = vld [vmem:[#allocation2 + $0x1e0] sm:$0xff]  ;;  %v426_v16 = vld [vmem:[#allocation2 + $0x1e8] sm:$0xff]  ;;  %v411_v19 = vld [vmem:[#allocation2 + $0x170] sm:$0xff] }
 0x134   :  { %v401_v12 = vld [vmem:[#allocation2 + $0x120] sm:$0xff]  ;;  %v402_v17 = vld [vmem:[#allocation2 + $0x128] sm:$0xff]  ;;  %v427_v20 = vld [vmem:[#allocation2 + $0x1f0] sm:$0xff] }
 0x135   :  { %735 = vmatpush3.bf16.msra.mxu0 %v369_v38  ;;  %v417_v14 = vld [vmem:[#allocation2 + $0x1a0] sm:$0xff]  ;;  %v418_v18 = vld [vmem:[#allocation2 + $0x1a8] sm:$0xff]  ;;  %v403_v21 = vld [vmem:[#allocation2 + $0x130] sm:$0xff] }
 0x136   :  { %757 = vmatpush3.bf16.msra.mxu1 %v385_v40  ;;  %736 = vmatprep.subr.bf16.mxu0 %v378_v41  ;;  %v419_v22 = vld [vmem:[#allocation2 + $0x1b0] sm:$0xff]  ;;  %v412_v23 = vld [vmem:[#allocation2 + $0x178] sm:$0xff]  ;;  %v429_v29 = vld [vmem:[#allocation2 + $0x200] sm:$0xff] }
 0x137   :  { %758 = vmatprep.subr.bf16.mxu1 %v394_v42  ;;  %v428_v24 = vld [vmem:[#allocation2 + $0x1f8] sm:$0xff]  ;;  %v430_v31 = vld [vmem:[#allocation2 + $0x208] sm:$0xff]  ;;  %v431_v32 = vld [vmem:[#allocation2 + $0x210] sm:$0xff] }
 0x138   :  { %v404_v25 = vld [vmem:[#allocation2 + $0x138] sm:$0xff]  ;;  %v433_v3 = vld [vmem:[#allocation2 + $0x220] sm:$0xff]  ;;  %v434_v13 = vld [vmem:[#allocation2 + $0x228] sm:$0xff] }
 0x139   :  { %737 = vmatpush3.bf16.msra.mxu0 %v370_v43  ;;  %v420_v26 = vld [vmem:[#allocation2 + $0x1b8] sm:$0xff]  ;;  %v435_v34 = vld [vmem:[#allocation2 + $0x230] sm:$0xff]  ;;  %v437_v36 = vld [vmem:[#allocation2 + $0x240] sm:$0x1] }
 0x13a   :  { %759 = vmatpush3.bf16.msra.mxu1 %v386_v44  ;;  %738 = vmatprep.subr.bf16.mxu0 %v379_v46  ;;  %v432_v33 = vld [vmem:[#allocation2 + $0x218] sm:$0xff]  ;;  %v438_v37 = vunpack.c.l.bf16 %v437_v36 }
 0x13b   :  { %760 = vmatprep.subr.bf16.mxu1 %v395_v47  ;;  %v436_v35 = vld [vmem:[#allocation2 + $0x238] sm:$0xff] }
 0x13c   :  { %v455_v41 = vrot.slane %v438_v37, %v1028_v39 }
 0x13d   :  { %739 = vmatpush3.bf16.msra.mxu0 %v371_v48 }
 0x13e   :  { %761 = vmatpush3.bf16.msra.mxu1 %v387_v49  ;;  %740 = vmatprep.subr.bf16.mxu0 %v380_v50 }
 0x13f   :  { %762 = vmatprep.subr.bf16.mxu1 %v396_v51 }
 0x141   :  { %741 = vmatpush3.bf16.msra.mxu0 %v372_v52 }
 0x142   :  { %763 = vmatpush3.bf16.msra.mxu1 %v388_v53  ;;  %770 = vmatprep.subr.bf16.mxu0 %v405_v54 }
 0x143   :  { %792 = vmatprep.subr.bf16.mxu1 %v421_v55 }
 0x144   :  { %489 = vmatmul.mubr.bf16.vlgmr.msra.gmra.mrb[0].mxu0 %v444_v57 }
 0x145   :  { %529 = vmatmul.mubr.bf16.vlgmr.msra.gmra.mrb[16].mxu1 %v446_v58  ;;  %771 = vmatpush3.bf16.msra.mxu0 %v397_v59 }
 0x146   :  { %793 = vmatpush3.bf16.msra.mxu1 %v413_v60  ;;  %772 = vmatprep.subr.bf16.mxu0 %v406_v61 }
 0x147   :  { %794 = vmatprep.subr.bf16.mxu1 %v422_v62  ;;  %568 = vmatprep.mubr.bf16.mxu0 %v449_v63 }
 0x148   :  { %608 = vmatprep.mubr.bf16.mxu1 %v451_v0 }
 0x149   :  { %773 = vmatpush3.bf16.msra.mxu0 %v398_v45 }
 0x14a   :  { %795 = vmatpush3.bf16.msra.mxu1 %v414_v56  ;;  %774 = vmatprep.subr.bf16.mxu0 %v407_v1 }
 0x14b   :  { %796 = vmatprep.subr.bf16.mxu1 %v423_v2  ;;  %v439_v2 = vld [vmem:[#allocation2 + $0x240] sm:$0x10] }
 0x14d   :  { %775 = vmatpush3.bf16.msra.mxu0 %v399_v4  ;;  %v441_v4 = vrot.slane %v439_v2, 4 }
 0x14e   :  { %797 = vmatpush3.bf16.msra.mxu1 %v415_v5  ;;  %776 = vmatprep.subr.bf16.mxu0 %v408_v6 }
 0x14f   :  { %798 = vmatprep.subr.bf16.mxu1 %v424_v7  ;;  %v443_v5 = vunpack.c.l.bf16 %v441_v4 }
 0x151   :  { %777 = vmatpush3.bf16.msra.mxu0 %v400_v8  ;;  %v621_v6 = vrot.slane %v443_v5, %v1028_v39 }
 0x152   :  { %799 = vmatpush3.bf16.msra.mxu1 %v416_v9  ;;  %778 = vmatprep.subr.bf16.mxu0 %v409_v10 }
 0x153   :  { %800 = vmatprep.subr.bf16.mxu1 %v425_v11 }
 0x155   :  { %779 = vmatpush3.bf16.msra.mxu0 %v401_v12 }
 0x156   :  { %801 = vmatpush3.bf16.msra.mxu1 %v417_v14  ;;  %780 = vmatprep.subr.bf16.mxu0 %v410_v15 }
 0x157   :  { %802 = vmatprep.subr.bf16.mxu1 %v426_v16 }
 0x159   :  { %781 = vmatpush3.bf16.msra.mxu0 %v402_v17 }
 0x15a   :  { %803 = vmatpush3.bf16.msra.mxu1 %v418_v18  ;;  %782 = vmatprep.subr.bf16.mxu0 %v411_v19 }
 0x15b   :  { %804 = vmatprep.subr.bf16.mxu1 %v427_v20 }
 0x15d   :  { %783 = vmatpush3.bf16.msra.mxu0 %v403_v21 }
 0x15e   :  { %805 = vmatpush3.bf16.msra.mxu1 %v419_v22  ;;  %784 = vmatprep.subr.bf16.mxu0 %v412_v23 }
 0x15f   :  { %806 = vmatprep.subr.bf16.mxu1 %v428_v24 }
 0x161   :  { %785 = vmatpush3.bf16.msra.mxu0 %v404_v25 }
 0x162   :  { %807 = vmatpush3.bf16.msra.mxu1 %v420_v26  ;;  %823 = vmatprep.subr.bf16.mxu0 %v958_v30 }
 0x164   :  { %569 = vmatmul.mubr.bf16.vlgmr.msra.gmra.mrb[4].mxu0 %v448_v27 }
 0x165   :  { %609 = vmatmul.mubr.bf16.vlgmr.msra.gmra.mrb[20].mxu1 %v450_v28  ;;  %824 = vmatpush3.bf16.msra.mxu0 %v429_v29 }
 0x166   :  { %825 = vmatprep.subr.bf16.mxu0 %v958_v30  ;;  %839 = vmatprep.mubr.msk.bf16.mxu0 %vm959_vm1, %v958_v30 }
 0x169   :  { %826 = vmatpush3.bf16.msra.mxu0 %v430_v31 }
 0x16a   :  { %827 = vmatprep.subr.bf16.mxu0 %v958_v30 }
 0x16d   :  { %828 = vmatpush3.bf16.msra.mxu0 %v431_v32 }
 0x16e   :  { %829 = vmatprep.subr.bf16.mxu0 %v958_v30 }
 0x171   :  { %830 = vmatpush3.bf16.msra.mxu0 %v432_v33 }
 0x172   :  { %831 = vmatprep.subr.bf16.mxu0 %v958_v30 }
 0x175   :  { %832 = vmatpush3.bf16.msra.mxu0 %v433_v3 }
 0x176   :  { %833 = vmatprep.subr.bf16.mxu0 %v958_v30 }
 0x179   :  { %834 = vmatpush3.bf16.msra.mxu0 %v434_v13 }
 0x17a   :  { %835 = vmatprep.subr.bf16.mxu0 %v958_v30 }
 0x17d   :  { %836 = vmatpush3.bf16.msra.mxu0 %v435_v34 }
 0x17e   :  { %837 = vmatprep.subr.bf16.mxu0 %v958_v30 }
 0x181   :  { %838 = vmatpush3.bf16.msra.mxu0 %v436_v35 }
 0x217   :  { %v742_v38 = vpop.f32.mrb[0].mxu0 }
 0x218   :  { %v764_v40 = vpop.f32.mrb[16].mxu1  ;;  %v743_v42 = vpop.f32.mrb[1].mxu0 }
 0x219   :  { %v765_v43 = vpop.f32.mrb[17].mxu1  ;;  %v744_v44 = vadd.f32 %v743_v42, %v742_v38  ;;  %v745_v47 = vpop.f32.mrb[2].mxu0 }
 0x21a   :  { %v766_v46 = vadd.f32 %v765_v43, %v764_v40  ;;  %v767_v48 = vpop.f32.mrb[18].mxu1  ;;  %v746_v49 = vpop.f32.mrb[3].mxu0 }
 0x21b   :  { %v768_v50 = vpop.f32.mrb[19].mxu1  ;;  %v491_v51 = vadd.f32 %v744_v44, %v455_v41 }
 0x21d   :  { %v531_v52 = vadd.f32 %v766_v46, %v491_v51 }
 0x237   :  { %v786_v53 = vpop.f32.mrb[4].mxu0 }
 0x238   :  { %v808_v54 = vpop.f32.mrb[20].mxu1  ;;  %v787_v55 = vpop.f32.mrb[5].mxu0 }
 0x239   :  { %v809_v57 = vpop.f32.mrb[21].mxu1  ;;  %v788_v58 = vadd.f32 %v787_v55, %v786_v53  ;;  %v789_v60 = vpop.f32.mrb[6].mxu0 }
 0x23a   :  { %v810_v59 = vadd.f32 %v809_v57, %v808_v54  ;;  %v811_v61 = vpop.f32.mrb[22].mxu1  ;;  %v790_v62 = vpop.f32.mrb[7].mxu0 }
 0x23b   :  { %v812_v63 = vpop.f32.mrb[23].mxu1  ;;  %v571_v0 = vadd.f32 %v788_v58, %v531_v52 }
 0x23d   :  { %v611_v45 = vadd.f32 %v810_v59, %v571_v0 }
 0x23f   :  { %v616_v56 = vmax.f32 %v611_v45, 0.0 }
 0x241   :  { %v617_v1 = vpack.c.bf16 %v616_v56, %v616_v56 }
 0x243   :  { %840 = vmatmul.mubr.bf16.vlgmr.msra.gmra.mrb[8].mxu0 %v617_v1 }
 0x316   :  { %v656_v7 = vpop.f32.mrb[8].mxu0 }
 0x317   :  { %v657_v8 = vadd.f32 %v656_v7, %v621_v6  ;;  %v841_v9 = vpop.f32.mrb[9].mxu0 }
 0x318   :  { %v659_v10 = vpop.f32.mrb[10].mxu0 }
 0x319   :  { %v663_v11 = vsel %vm662_vm2, %v657_v8, -inf  ;;  %v842_v12 = vpop.f32.mrb[11].mxu0 }
 0x31a   :  { %v664_v14 = vrot.slane %v663_v11, 4 }
 0x31c   :  { %v665_v15 = vmax.f32 %v663_v11, %v664_v14 }
 0x31e   :  { %v666_v16 = vrot.slane %v665_v15, 2 }
 0x320   :  { %v667_v17 = vmax.f32 %v665_v15, %v666_v16 }
 0x322   :  { %v668_v18 = vrot.slane %v667_v17, 1 }
 0x324   :  { %v669_v19 = vmax.f32 %v667_v17, %v668_v18 }
 0x326   :  { %v670_v20 = vsub.f32 %v657_v8, %v669_v19 }
 0x328   :  { %v671_v21 = vmul.f32 1.442695, %v670_v20 }
 0x32a   :  { %852 = vpow2.f32 %v671_v21 }
 0x334   :  { %v853_v22 = vpop.eup %852 }
 0x335   :  { %v673_v39 = vsel %vm662_vm2, %v853_v22, 0.0 }
 0x336   :  { %v674_v23 = vrot.slane %v673_v39, 4 }
 0x338   :  { %v675_v24 = vadd.f32 %v674_v23, %v673_v39 }
 0x33a   :  { %v676_v25 = vrot.slane %v675_v24, 2 }
 0x33c   :  { %v677_v26 = vadd.f32 %v676_v25, %v675_v24 }
 0x33e   :  { %v678_v27 = vrot.slane %v677_v26, 1 }
 0x340   :  { %v679_v28 = vadd.f32 %v678_v27, %v677_v26 }
 0x342   :  { %854 = vrcp.f32 %v679_v28 }
 0x34c   :  { %v855_v29 = vpop.eup %854 }
 0x34d   :  { %v681_v30 = vmul.f32 %v855_v29, %v853_v22 }
 0x34f   :  { %682 = vst.msk [vmem:[#allocation9] sm:$0xff] %vm662_vm2, %v681_v30 }
 0x350   :  { %933 = shalt.err (!%p930_p0)
}
 0x351   :  { %s934_s25 = scalar_lea.hbm %s1082_s3, 128 }
 0x352   :  { %p935_p1 = scmp.ne.s32.totalorder %s1082_s3, %s934_s25  ;;  %p938_p2 = scmp.lt.u32.totalorder %s934_s25, %s1082_s3 }
 0x354   :  { %p940_p3 = pnand %p938_p2, %p935_p1 }
 0x356   :  { %943 = shalt.err (!%p940_p3)
}
 0x357   :  { %692 = dma.vmem_to_hbm [thread:$0]  %s690_s21, 128, %s1082_s3, [#allocation6]  }
 0x358   :  { %950 = dma.done.wait [#allocation6], 128  }
 0x359   :  { %951 = vsyncadd [#allocation6], 4294967168 }
 0x35a   :  { %696 = vsyncpa [#allocation5], 1 }
 0x35b   :  { %697 = vsyncpa [#allocation8], 1 }
 0x35c   :  { %698 = vsyncpa [#allocation6], 1 }
 0x35d   :  { %699 = vsyncmov [#allocation3] }
 0x360   :  { %s700_s5 = vpop.sfrf %699 }
 0x361   :  { %p725_p4 = scmp.ne.s32.totalorder %s700_s5, 0 }
 0x363   :  { %704 = shalt.err (%p725_p4)  }

</bundles_post_ra>
